<compile_context>
chip_gen: v6e
topology: v6e:2x2x1
jax: 0.10.0
libtpu: 0.0.40
codegen_flags: <defaults>
</compile_context>

<pallas_src>
import jax
import jax.numpy as jnp
from jax.experimental import pallas as pl
from jax.experimental.pallas import tpu as pltpu

_LANES = 128                     # vreg lane width; last dim multiple => unmasked vst
_TILE_BYTES_CAP = 4 * 1024 * 1024    # ~4 MiB tiles: near roofline on v6e/v7x
_MIN_SPLIT_BYTES = 1 * 1024 * 1024   # only split the grid if tiles stay >= ~1 MiB
_VMEM_LIMIT = 32 * 1024 * 1024       # explicit scoped-VMEM limit (safe on v5e..v7x)

# Minimum sublane count for the second-to-last dim, by dtype itemsize.
_SUBLANE_MIN = {4: 8, 2: 16, 1: 32}


def _round_up(a, b):
    return -(-a // b) * b


def _round_down(a, b):
    return (a // b) * b


def _silu_kernel(x_ref, o_ref):
    # x_ref / o_ref: (block_rows, 128) tiles resident in VMEM.
    x = x_ref[...]
    o_ref[...] = x * jax.nn.sigmoid(x)


def silu_forward(x, *, min_pallas_elems=16384):
    """Elementwise SiLU: x * sigmoid(x). Works for any input shape/size/dtype.

    The wrapper only does layout plumbing: flatten -> (rows, 128) lane-dense
    slab (padding only to the dtype's sublane minimum, and only if needed) ->
    tile rows with a parallel grid.
    """
    orig_shape = x.shape
    orig_dtype = x.dtype
    n = x.size

    # Small-input fast path: a single fused XLA elementwise op is strictly
    # cheaper than any kernel launch at these sizes.
    if n < min_pallas_elems:
        return x * jax.nn.sigmoid(x)

    itemsize = jnp.dtype(orig_dtype).itemsize
    sub_min = _SUBLANE_MIN.get(itemsize, 8)

    # Rows of 128 lanes, rounded up to the dtype's packed sublane minimum.
    rows = pl.cdiv(n, _LANES)
    rows_a = _round_up(rows, sub_min)

    row_bytes = _LANES * itemsize
    cap_rows = max(sub_min, _round_down(_TILE_BYTES_CAP // row_bytes, sub_min))
    min_split_rows = max(sub_min, _round_up(_MIN_SPLIT_BYTES // row_bytes, sub_min))

    if rows_a >= 4 * min_split_rows:
        # Large input: >= 4 grid steps (>= 2 blocks per TC on v7x for DMA
        # overlap), with tiles as big as the cap allows.
        block_rows = min(cap_rows, _round_up(pl.cdiv(rows_a, 4), sub_min))
    else:
        # Small/mid input: a single full-size block; no forced split.
        block_rows = rows_a
    block_rows = max(sub_min, min(block_rows, rows_a))

    padded_n = rows_a * _LANES
    flat = x.reshape(-1)
    if padded_n != n:
        # silu(0) == 0, so zero padding is harmless; sliced off below.
        flat = jnp.pad(flat, (0, padded_n - n))
    x2 = flat.reshape(rows_a, _LANES)

    grid = (pl.cdiv(rows_a, block_rows),)

    # TODO(synk): on v7x, verify in a profile that the single "parallel" axis
    # shards across both TensorCores; switch to CORE_PARALLEL if one TC idles.
    out2 = pl.pallas_call(
        _silu_kernel,
        out_shape=jax.ShapeDtypeStruct((rows_a, _LANES), orig_dtype),
        grid=grid,
        in_specs=[pl.BlockSpec((block_rows, _LANES), lambda i: (i, 0))],
        out_specs=pl.BlockSpec((block_rows, _LANES), lambda i: (i, 0)),
        compiler_params=pltpu.CompilerParams(
            dimension_semantics=("parallel",),
            vmem_limit_bytes=_VMEM_LIMIT),
    )(x2)

    if padded_n != n:
        return out2.reshape(-1)[:n].reshape(orig_shape)
    return out2.reshape(orig_shape)


def silu_reference(x):
    return x * jax.nn.sigmoid(x)


# TODO(synk): the `inplace=True` (x.mul_) variant would map to
# input_output_aliases={0: 0}; out-of-place semantics are kept here.


if __name__ == "__main__":
    key = jax.random.PRNGKey(0)
    k1, k2 = jax.random.split(key)

    # Module-implied small NCHW activation.
    x = jax.random.normal(k1, (2, 4, 16, 16), dtype=jnp.float32)

    # Force the Pallas path even at this small size so the kernel is exercised.
    out = silu_forward(x, min_pallas_elems=0)
    jax.block_until_ready(out)
    ref = silu_reference(x)
    assert out.shape == x.shape and out.dtype == x.dtype
    assert jnp.allclose(out, ref, atol=1e-6, rtol=1e-6)

    # Non-multiple-of-128 element count: exercises the pad-to-sublane path.
    x_odd = jax.random.normal(k2, (3, 5, 7, 11), dtype=jnp.float32)
    out_odd = silu_forward(x_odd, min_pallas_elems=0)
    jax.block_until_ready(out_odd)
    assert jnp.allclose(out_odd, silu_reference(x_odd), atol=1e-6, rtol=1e-6)

    # Default path (XLA fast path at this size) must match too.
    out_default = silu_forward(x)
    jax.block_until_ready(out_default)
    assert jnp.allclose(out_default, ref, atol=1e-6, rtol=1e-6)

    print("KERNEL_OK")
</pallas_src>

<mosaic_0001>
module attributes {stable_mosaic.version = 11 : i64} {
  func.func @_silu_kernel(%arg0: i32, %arg1: memref<16x128xf32, #tpu.memory_space<vmem>>, %arg2: memref<16x128xf32, #tpu.memory_space<vmem>>) attributes {dimension_semantics = [#tpu.dimension_semantics<parallel>], iteration_bounds = array<i64: 1>, scalar_prefetch = 0 : i64, scratch_operands = 0 : i64, tpu.core_type = #tpu.core_type<tc>, window_params = [{transform_indices = @transform_0, window_bounds = array<i64: 16, 128>}, {transform_indices = @transform_1, window_bounds = array<i64: 16, 128>}]} {
    %c0 = arith.constant 0 : index
    %c0_0 = arith.constant 0 : index
    %0 = vector.load %arg1[%c0, %c0_0] : memref<16x128xf32, #tpu.memory_space<vmem>>, vector<16x128xf32>
    %1 = arith.negf %0 : vector<16x128xf32>
    %2 = math.exp %1 : vector<16x128xf32>
    %cst = arith.constant 1.000000e+00 : f32
    %3 = vector.broadcast %cst : f32 to vector<16x128xf32>
    %4 = arith.addf %3, %2 : vector<16x128xf32>
    %5 = arith.divf %3, %4 : vector<16x128xf32>
    %6 = arith.mulf %0, %5 : vector<16x128xf32>
    %c0_1 = arith.constant 0 : index
    %c0_2 = arith.constant 0 : index
    %7 = vector.load %arg2[%c0_1, %c0_2] : memref<16x128xf32, #tpu.memory_space<vmem>>, vector<16x128xf32>
    tpu.vector_store %arg2[%c0_1, %c0_2], %6 {strides = array<i32>} : memref<16x128xf32, #tpu.memory_space<vmem>>, vector<16x128xf32>,
    return
  }
  func.func @transform_0(%arg0: i32) -> (i32, i32) {
    %c0_i32 = arith.constant 0 : i32
    %c0_i32_0 = arith.constant 0 : i32
    return %arg0, %c0_i32 : i32, i32
  }
  func.func @transform_1(%arg0: i32) -> (i32, i32) {
    %c0_i32 = arith.constant 0 : i32
    %c0_i32_0 = arith.constant 0 : i32
    return %arg0, %c0_i32 : i32, i32
  }
}

</mosaic_0001>

<bundles_post_ra>
// kernel: tpu_custom_call.1
= control target key start
LH: loop header
LB: loop body
LE: loop exit
PB: predicated region body
PF: predicated region fallthrough
CT: control target
= control target key end

     0   :  { %6 = vsyncpa [#allocation3], 0  ;;  %s142_s0 = inlined_call_operand.hbm [shape: f32[16,128], index: 0, kind: input, shape index: {}]   ;;  %s143_s1 = inlined_call_operand.hbm [shape: f32[16,128], index: 1, kind: output, shape index: {}]  }
   0x1   :  { %7 = vsyncpa [#allocation4], 0  ;;  %s116_s6 = smov [#allocation2]  }
   0x2   :  { %s13_s7 = sshll.u32 %s116_s6, 4  ;;  %s14_s7 = int_to_ptr.vmem [resolvable:$true] %s13_s7 }
   0x3   :  { %s80_s8 = scalar_lea.vmem %s14_s7, 256  ;;  %p85_p1 = scmp.lt.s32.totalorder %s14_s7, %s14_s7 }
   0x4   :  { %p81_p0 = scmp.ne.s32.totalorder %s14_s7, %s80_s8  ;;  %p86_p2 = scmp.lt.s32.totalorder %s80_s8, %s80_s8 }
   0x6   :  { %p87_p3 = por %p86_p2, %p85_p1 }
   0x8   :  { %p88_p4 = pnand %p87_p3, %p81_p0 }
   0xa   :  { %91 = shalt.err (!%p88_p4)
}
   0xb   :  { %s117_s9 = smov 128   ;;  %s118_s10 = smov 8  }
   0xc   :  { %19 = dma.hbm_to_vmem [thread:$0]  %s142_s0, 256, %s14_s7, [#allocation3], %s117_s9, %s117_s9, %s118_s10  }
   0xd   :  { %112 = dma.done.wait [#allocation3], 256  }
   0xe   :  { %113 = vsyncadd [#allocation3], 4294967040  ;;  %v23_v0 = vld [vmem:[#allocation2] sm:$0xff]  ;;  %v24_v1 = vld [vmem:[#allocation2 + $0x8] sm:$0xff]  ;;  %s119_s13 = smov [#allocation5]  }
   0xf   :  { %v58_v2 = vmul.f32 -1.442695, %v23_v0  ;;  %v59_v3 = vmul.f32 -1.442695, %v24_v1  ;;  %s46_s14 = sshll.u32 %s119_s13, 4  ;;  %s47_s14 = int_to_ptr.vmem [resolvable:$true] %s46_s14 }
  0x10   :  { %s92_s0 = scalar_lea.vmem %s47_s14, 256  ;;  %p97_p6 = scmp.lt.s32.totalorder %s47_s14, %s47_s14 }
  0x11   :  { %64 = vpow2.f32 %v58_v2  ;;  %p93_p5 = scmp.ne.s32.totalorder %s47_s14, %s92_s0  ;;  %p98_p7 = scmp.lt.s32.totalorder %s92_s0, %s92_s0 }
  0x12   :  { %66 = vpow2.f32 %v59_v3 }
  0x13   :  { %p99_p8 = por %p98_p7, %p97_p6 }
  0x15   :  { %p100_p9 = pnand %p99_p8, %p93_p5 }
  0x1e   :  { %v65_v4 = vpop.eup %64 }
  0x1f   :  { %v67_v5 = vpop.eup %66  ;;  %v31_v6 = vadd.f32 1.0, %v65_v4 }
  0x20   :  { %v32_v7 = vadd.f32 1.0, %v67_v5 }
  0x21   :  { %68 = vrcp.f32 %v31_v6 }
  0x22   :  { %70 = vrcp.f32 %v32_v7 }
  0x2e   :  { %v69_v8 = vpop.eup %68 }
  0x2f   :  { %v71_v9 = vpop.eup %70  ;;  %v37_v10 = vmul.f32 %v69_v8, %v23_v0 }
  0x30   :  { %v38_v11 = vmul.f32 %v71_v9, %v24_v1 }
  0x31   :  { %39 = vst [vmem:[#allocation5] sm:$0xff] %v37_v10 }
  0x32   :  { %40 = vst [vmem:[#allocation5 + $0x8] sm:$0xff] %v38_v11 }
  0x33   :  { %103 = shalt.err (!%p100_p9)
}
  0x34   :  { %52 = dma.vmem_to_hbm [thread:$0]  %s47_s14, 256, %s143_s1, [#allocation4], %s117_s9, %s117_s9, %s118_s10  }
  0x35   :  { %114 = dma.done.wait [#allocation4], 256  }
  0x36   :  { %115 = vsyncadd [#allocation4], 4294967040 }
  0x37   :  { %56 = vsyncpa [#allocation3], 1 }
  0x38   :  { %57 = vsyncpa [#allocation4], 1 }

</bundles_post_ra>
